<compile_context>
chip_gen: v7x
topology: tpu7x:2x2x1
jax: 0.10.0
libtpu: 0.0.40
codegen_flags: <defaults>
</compile_context>

<pallas_src>
import functools

import jax
import jax.numpy as jnp
from jax.experimental import pallas as pl
from jax.experimental.pallas import tpu as pltpu


def _word_dropout_kernel(x_ref, u_ref, o_ref, *, p: float, keep_exp: bool):
    # x_ref / o_ref: (1, tS, H);  u_ref: (1, tS, 1) f32 uniforms in [0, 1).
    scale = 1.0 / (1.0 - p) if keep_exp else 1.0
    # Bernoulli(1 - p): keep the word iff u >= p.  Fold the rescale into the
    # tiny (1, tS, 1) mask (kept in f32) so the (tS, H) work is one multiply.
    keep_scaled = jnp.where(u_ref[...] >= jnp.float32(p),
                            jnp.float32(scale), jnp.float32(0.0))
    o_ref[...] = (x_ref[...] * keep_scaled).astype(o_ref.dtype)


def _uniform_word_noise(seed: int, batch: int, seq: int) -> jax.Array:
    """One uniform per (batch, seq) position — the per-word dropout noise."""
    return jax.random.uniform(jax.random.PRNGKey(seed), (batch, seq, 1),
                              dtype=jnp.float32)


def word_dropout(x, seed: int, *, p: float = 0.05, keep_exp: bool = False,
                 training: bool = True):
    """Pallas equivalent of WordDropout.forward."""
    if p < 0 or p >= 1:
        raise ValueError(
            f'dropout probability has to be between 0 and 1, but got {p}')
    if not training or p == 0:
        return x

    B, S, H = x.shape
    u = _uniform_word_noise(seed, B, S)

    # --- sequence tiling -----------------------------------------------------
    # Target ~8 MiB per x block; with double-buffered in + out that is ~32 MiB
    # of VMEM, comfortably inside every generation's budget (incl. v7x 64 MiB).
    dtype_bytes = jnp.dtype(x.dtype).itemsize
    target_block_bytes = 8 * 1024 * 1024
    ts = (target_block_bytes // max(1, H * dtype_bytes)) // 8 * 8
    ts = int(min(S, max(8, ts)))          # ts is a multiple of 8, or ts == S

    grid = (B, pl.cdiv(S, ts))

    kernel = functools.partial(_word_dropout_kernel, p=float(p),
                               keep_exp=bool(keep_exp))

    cost = pl.CostEstimate(
        flops=2 * B * S * H,
        transcendentals=0,
        bytes_accessed=2 * B * S * H * dtype_bytes + B * S * 4,
    )

    return pl.pallas_call(
        kernel,
        out_shape=jax.ShapeDtypeStruct((B, S, H), x.dtype),
        grid=grid,
        in_specs=[
            pl.BlockSpec((1, ts, H), lambda b, s: (b, s, 0)),
            pl.BlockSpec((1, ts, 1), lambda b, s: (b, s, 0)),
        ],
        out_specs=pl.BlockSpec((1, ts, H), lambda b, s: (b, s, 0)),
        compiler_params=pltpu.CompilerParams(
            dimension_semantics=("parallel", "parallel"),
            vmem_limit_bytes=48 * 1024 * 1024,
        ),
        cost_estimate=cost,
    )(x, u)


if __name__ == "__main__":
    import numpy as np

    key = jax.random.PRNGKey(0)
    B, S, H = 2, 8, 32
    x = jax.random.normal(key, (B, S, H), dtype=jnp.float32)

    # Training mode, default p (no rescale).
    p1, seed1 = 0.05, 1234
    y = jax.block_until_ready(
        word_dropout(x, seed1, p=p1, keep_exp=False, training=True))

    # Training mode with keep_exp rescale (larger p so drops are likely).
    p2, seed2 = 0.5, 42
    y2 = jax.block_until_ready(
        word_dropout(x, seed2, p=p2, keep_exp=True, training=True))

    # Eval mode: identity.
    y_eval = word_dropout(x, 7, p=0.05, training=False)

    # --- pure-JAX reference using the identical uniform draw -----------------
    def ref(x, seed, p, keep_exp):
        u = _uniform_word_noise(seed, x.shape[0], x.shape[1])
        m = (u >= jnp.float32(p)).astype(jnp.float32)
        scale = 1.0 / (1.0 - p) if keep_exp else 1.0
        return x * m * scale

    np.testing.assert_allclose(np.asarray(y),
                               np.asarray(ref(x, seed1, p1, False)),
                               rtol=1e-6, atol=1e-6)
    np.testing.assert_allclose(np.asarray(y2),
                               np.asarray(ref(x, seed2, p2, True)),
                               rtol=1e-6, atol=1e-6)
    assert np.allclose(np.asarray(y_eval), np.asarray(x)), \
        "eval mode must be identity"

    # Whole-word (all-or-none) dropout semantics.
    yn, xn = np.asarray(y), np.asarray(x)
    for b in range(B):
        for s in range(S):
            row, refrow = yn[b, s], xn[b, s]
            assert np.allclose(row, refrow) or np.allclose(row, 0.0), \
                "row must be fully kept or fully dropped"
    y2n = np.asarray(y2)
    sc = 1.0 / (1.0 - p2)
    for b in range(B):
        for s in range(S):
            row, refrow = y2n[b, s], xn[b, s] * sc
            assert np.allclose(row, refrow) or np.allclose(row, 0.0), \
                "keep_exp row must be rescaled-kept or fully dropped"

    print("KERNEL_OK")
</pallas_src>

<mosaic_0001>
module attributes {stable_mosaic.version = 11 : i64} {
  func.func @_word_dropout_kernel(%arg0: i32, %arg1: i32, %arg2: memref<1x8x32xf32, #tpu.memory_space<vmem>>, %arg3: memref<1x8x1xf32, #tpu.memory_space<vmem>>, %arg4: memref<1x8x32xf32, #tpu.memory_space<vmem>>) attributes {dimension_semantics = [#tpu.dimension_semantics<parallel>, #tpu.dimension_semantics<parallel>], iteration_bounds = array<i64: 2, 1>, scalar_prefetch = 0 : i64, scratch_operands = 0 : i64, tpu.core_type = #tpu.core_type<tc>, window_params = [{transform_indices = @transform_0, window_bounds = array<i64: 1, 8, 32>}, {transform_indices = @transform_1, window_bounds = array<i64: 1, 8, 1>}, {transform_indices = @transform_2, window_bounds = array<i64: 1, 8, 32>}]} {
    %c0 = arith.constant 0 : index
    %c0_0 = arith.constant 0 : index
    %c0_1 = arith.constant 0 : index
    %0 = vector.load %arg3[%c0, %c0_0, %c0_1] : memref<1x8x1xf32, #tpu.memory_space<vmem>>, vector<1x8x1xf32>
    %cst = arith.constant 5.000000e-02 : f32
    %1 = vector.broadcast %cst : f32 to vector<1x8x1xf32>
    %2 = arith.cmpf oge, %0, %1 : vector<1x8x1xf32>
    %cst_2 = arith.constant 1.000000e+00 : f32
    %cst_3 = arith.constant 0.000000e+00 : f32
    %3 = vector.broadcast %cst_2 : f32 to vector<1x8x1xf32>
    %4 = vector.broadcast %cst_3 : f32 to vector<1x8x1xf32>
    %5 = arith.select %2, %3, %4 : vector<1x8x1xi1>, vector<1x8x1xf32>
    %c0_4 = arith.constant 0 : index
    %c0_5 = arith.constant 0 : index
    %c0_6 = arith.constant 0 : index
    %6 = vector.load %arg2[%c0_4, %c0_5, %c0_6] : memref<1x8x32xf32, #tpu.memory_space<vmem>>, vector<1x8x32xf32>
    %7 = vector.broadcast %5 : vector<1x8x1xf32> to vector<1x8x32xf32>
    %8 = arith.mulf %6, %7 : vector<1x8x32xf32>
    %c0_7 = arith.constant 0 : index
    %c0_8 = arith.constant 0 : index
    %c0_9 = arith.constant 0 : index
    %9 = vector.load %arg4[%c0_7, %c0_8, %c0_9] : memref<1x8x32xf32, #tpu.memory_space<vmem>>, vector<1x8x32xf32>
    tpu.vector_store %arg4[%c0_7, %c0_8, %c0_9], %8 {strides = array<i32>} : memref<1x8x32xf32, #tpu.memory_space<vmem>>, vector<1x8x32xf32>,
    return
  }
  func.func @transform_0(%arg0: i32, %arg1: i32) -> (i32, i32, i32) {
    %c0_i32 = arith.constant 0 : i32
    %c0_i32_0 = arith.constant 0 : i32
    return %arg0, %arg1, %c0_i32 : i32, i32, i32
  }
  func.func @transform_1(%arg0: i32, %arg1: i32) -> (i32, i32, i32) {
    %c0_i32 = arith.constant 0 : i32
    %c0_i32_0 = arith.constant 0 : i32
    return %arg0, %arg1, %c0_i32 : i32, i32, i32
  }
  func.func @transform_2(%arg0: i32, %arg1: i32) -> (i32, i32, i32) {
    %c0_i32 = arith.constant 0 : i32
    %c0_i32_0 = arith.constant 0 : i32
    return %arg0, %arg1, %c0_i32 : i32, i32, i32
  }
}

</mosaic_0001>

<bundles_post_ra>
// kernel: tpu_custom_call.1
= control target key start
LH: loop header
LB: loop body
LE: loop exit
PB: predicated region body
PF: predicated region fallthrough
CT: control target
= control target key end

     0   :  { %7 = vsyncpa [#allocation3], 0  ;;  %s588_s0 = inlined_call_operand.vmem [shape: f32[2,8,32], index: 0, kind: input, shape index: {}]   ;;  %s589_s1 = inlined_call_operand.vmem [shape: f32[2,8,1], index: 1, kind: input, shape index: {}]   ;;  %s590_s2 = inlined_call_operand.hbm [shape: f32[2,8,32], index: 2, kind: output, shape index: {}]  }
   0x1   :  { %9 = vsyncpa [#allocation3 + $0x1], 0  ;;  %s473_s9 = smov 0   ;;  %s475_s10 = smov 0  }
   0x2   :  { %s477_s11 = smov 0   ;;  %s479_s12 = smov 0  }
   0x3   :  { %s481_s13 = smov 0   ;;  %s483_s14 = smov 0  }
   0x4 LB: > { %s305_s15 = sadd.s32 4294967295, %s453_s14   ;;  %s306_s16 = sadd.s32 4294967294, %s453_s14   ;;  %s453_s14 = sphi %s483_s14, %s15_s14   ;;  %s449_s13 = sphi %s481_s13, %s597_s13   ;;  %s445_s12 = sphi %s479_s12, %s596_s12   ;;  %s441_s11 = sphi %s477_s11, %s595_s11   ;;  %s437_s10 = sphi %s475_s10, %s594_s10   ;;  %s433_s9 = sphi %s473_s9, %s593_s9  }
   0x5   : > { %s27_s17 = sadd.s32 1, %s449_s13  ;;  %s92_s18 = sadd.s32 1, %s441_s11 }
   0x6   : > { %p29_p0 = scmp.ge.s32.totalorder %s27_s17, 2  ;;  %p102_p1 = scmp.ne.s32.totalorder %s441_s11, %s437_s10 }
   0x7   : > { %p103_p2 = scmp.eq.s32.totalorder %s305_s15, 1  ;;  %p108_p3 = scmp.ne.s32.totalorder %s437_s10, %s433_s9 }
   0x8   : > { %s599_s17 = smov (%p29_p0, %s27_s17), 0  ;;  %p109_p5 = scmp.eq.s32.totalorder %s306_s16, 1 }
   0x9   : > { %p513_p4 = por %p103_p2, %p102_p1  ;;  %s87_s20 = ssub.s32 %s449_s13, %s599_s17 }
   0xa   : > { %p309_p6 = scmp.ge.s32.totalorder %s453_s14, 1  ;;  %p90_p7 = scmp.eq.s32.totalorder %s87_s20, 0 }
   0xb   : > { %p520_p8 = por %p109_p5, %p108_p3  ;;  %p147_p9 = scmp.lt.s32.totalorder %s453_s14, 3 }
   0xc   : > { %s526_s22 = scalar_select %p90_p7, %s441_s11, %s92_s18  }
   0xd   : > { %p148_p10 = pnand %p309_p6, %p147_p9 }
   0xe   : > { %p178_p11 = scmp.lt.s32.totalorder (!%p148_p10), %s445_s12, 1  ;;  %v455_v0 = vmov (!%p148_p10), 0   ;;  %v456_v2 = vmov (!%p148_p10), 0.0   ;;  %s175_s28 = sand.u32 (!%p148_p10), 1, %s437_s10   ;;  %vm202_vm1 = vcmask (!%p148_p10), 261120  }
   0xf   : > { %151 = sbr.rel (%p148_p10) target bundleno = 173 (0xad), region = 28  ;;  %374 = vset.pattern.permute.xlu0 (!%p148_p10), %v455_v0  ;;  %s310_s29 = sshll.u32 (!%p148_p10), %s175_s28, 3 }
  0x10   : > { %s314_s5 = sshll.u32 (!%p148_p10), %s445_s12, 7  ;;  %s177_s6 = scalar_lea.vmem (!%p148_p10), [#allocation2], %s310_s29 }
  0x11   : > { %s219_s7 = sshll.u32 (!%p148_p10), %s177_s6, 4  ;;  %s541_s16 = scalar_lea.hbm (!%p148_p10), %s590_s2, %s314_s5  ;;  %s543_s7 = int_to_ptr.vmem [resolvable:$true] %s219_s7 }
  0x12   : > { %s205_s18 = scalar_lea.sflag (!%p148_p10), [#allocation3], %s175_s28  ;;  %s375_s20 = scalar_lea.vmem (!%p148_p10), %s543_s7, 128 }
  0x13   : > { %p376_p12 = scmp.ne.s32.totalorder (!%p148_p10), %s543_s7, %s375_s20 }
  0x15   : > { %p377_p13 = pnand (!%p148_p10), %p376_p12, %p513_p4 }
  0x16   : > { %s179_s23 = scalar_select %p178_p11, %s445_s12, 1 }
  0x17   : > { %p378_p0 = pneg %p377_p13  ;;  %s457_s12 = smov [#allocation2]  }
  0x18   : > { %s311_s24 = sshll.u32 %s179_s23, 3  ;;  %s379_s23 = sshll.u32 %s457_s12, 4  ;;  %s380_s23 = int_to_ptr.vmem [resolvable:$false] %s379_s23 }
  0x19   : > { %s191_s27 = scalar_lea.vmem %s589_s1, %s311_s24  ;;  %s184_s4 = scalar_lea.vmem %s588_s0, %s311_s24 }
  0x1a   : > { %v192_v1 = vld [vmem:[%s191_s27] sm:$0xff]  ;;  %s381_s24 = scalar_lea.vmem %s380_s23, 256  ;;  %p382_p1 = scmp.lt.s32.totalorder %s543_s7, %s380_s23 }
  0x1b   : > { %vm193_vm0 = vcmp.ge.f32.partialorder %v192_v1, 0.05  ;;  %v195_v4 = vld [vmem:[%s184_s4] sm:$0xff]  ;;  %p383_p2 = scmp.lt.s32.totalorder %s381_s24, %s375_s20 }
  0x1c   : > { %v194_v3 = vsel %vm193_vm0, 1.0, %v456_v2 }
  0x1d   : > { %198 = vperm.xlu0 %374, %v194_v3   ;;  %p384_p3 = por %p383_p2, %p382_p1 }
  0x1f   : > { %p385_p5 = pnand %p384_p3, %p378_p0 }
  0x9c   : > { %v199_v5 = vpop.permute.xlu0 %198 }
  0x9d   : > { %v201_v6 = vmul.f32 %v199_v5, %v195_v4 }
  0x9f   : > { %203 = vst.msk [vmem:[%s177_s6] sm:$0xff] %vm202_vm1, %v201_v6 }
  0xa0   : > { %388 = shalt.err (!%p385_p5)
}
  0xa1   : > { %s389_s25 = scalar_lea.hbm %s541_s16, 128  ;;  %s393_s28 = scalar_lea.hbm %s590_s2, 256 }
  0xa2   : > { %p390_p6 = scmp.ne.s32.totalorder %s541_s16, %s389_s25  ;;  %p394_p10 = scmp.lt.u32.totalorder %s541_s16, %s590_s2 }
  0xa3   : > { %p395_p11 = scmp.lt.u32.totalorder %s393_s28, %s389_s25  ;;  %p397_p13 = scmp.lt.u32.totalorder %s389_s25, %s541_s16 }
  0xa4   : > { %p391_p7 = pnand %p390_p6, %p513_p4 }
  0xa5   : > { %p396_p12 = por %p395_p11, %p394_p10 }
  0xa6   : > { %p392_p9 = pneg %p391_p7 }
  0xa7   : > { %p398_p0 = por %p397_p13, %p396_p12 }
  0xa9   : > { %p399_p1 = pnand %p398_p0, %p392_p9 }
  0xab   : > { %402 = shalt.err (!%p399_p1)
}
  0xac   : > { %317 = dma.vmem_to_hbm [thread:$0]  (%p513_p4), %s543_s7, 128, %s541_s16, %s205_s18  }
  0xad PF: > { %p323_p2 = scmp.ge.s32.totalorder %s453_s14, 2  ;;  %s231_s3 = sand.u32 1, %s433_s9  }
  0xae   : > { %s232_s4 = scalar_lea.sflag [#allocation3], %s231_s3 }
  0xaf   : > { %p320_p3 = pnand %p323_p2, %p520_p8 }
  0xb1   : > { %428 = dma.done.wait (!%p320_p3), %s232_s4, 128  }
  0xb2   : > { %430 = vsyncadd (!%p320_p3), %s232_s4, 4294967168  ;;  %s15_s14 = sadd.s32 1, %s453_s14   ;;  %s593_s9 = smov %s437_s10 }
  0xb3   : > { %p12_p5 = scmp.ge.s32.totalorder %s15_s14, 4   ;;  %s594_s10 = smov %s441_s11 }
  0xb4   : > { %s595_s11 = smov %s526_s22  ;;  %s596_s12 = smov %s449_s13 }
  0xb5   : > { %s597_s13 = smov %s599_s17  ;;  %14 = sbr.rel (!%p12_p5) target bundleno = 4 (0x4), region = 66 }
  0xbc   :  { %237 = vsyncpa [#allocation3], 1 }
  0xbd   :  { %239 = vsyncpa [#allocation3 + $0x1], 1 }

</bundles_post_ra>
